<compile_context>
chip_gen: v5e
topology: v5e:2x2
jax: 0.10.0
libtpu: 0.0.40
codegen_flags: <defaults>
</compile_context>

<pallas_src>
import jax
import jax.numpy as jnp
from jax.experimental import pallas as pl
from jax.experimental.pallas import tpu as pltpu

raw_text = ('We are about to study the idea of a computational process.\n'
            'Computational processes are abstract beings that inhabit computers.\n'
            'As they evolve, processes manipulate other abstract things called data.\n'
            'The evolution of a process is directed by a pattern of rules\n'
            'called a program. People create programs to direct processes. In effect,\n'
            'we conjure spirits of computer with our spells.').split()

VOCAB_SIZE = len(set(raw_text))
EMBEDDING_DIM = 32
CONTEXT_SIZE = 2
CONTEXT_LEN = 2 * CONTEXT_SIZE   # CBOW context window (left + right)

LANE = 128                       # TPU lane width (last-dim tile)
SUBLANE = 8                      # sublane granularity
MAX_BATCH_TILE = 256             # examples per grid step (fills the MXU)
_NEG_BIG = -1e30                 # bias padding -> exp() == 0 on padded vocab lanes


def _round_up(x, m):
    return (x + m - 1) // m * m


def cbow_kernel(idx_ref, emb_ref, w_t_ref, b_ref, out_ref):
    """One batch tile of the CBOW forward.

    idx_ref : VMEM (TB, CONTEXT_LEN) int32 -- context indices for this tile
    emb_ref : VMEM (V_e, D_pad) f32        -- embedding table, zero-padded, resident
    w_t_ref : VMEM (D_pad, V_pad) f32      -- linear weight, transposed + padded
    b_ref   : VMEM (1, V_pad) f32          -- bias, -1e30 on padded vocab lanes
    out_ref : VMEM (TB, V_pad) f32         -- log-softmax output tile
    """
    tb = out_ref.shape[0]
    v_e = emb_ref.shape[0]

    # --- One-hot / count-matrix embedding gather (VPU) ----------------------
    idx = idx_ref[...]                                            # (TB, C) i32
    iota_v = jax.lax.broadcasted_iota(jnp.int32, (tb, v_e), 1)    # (TB, V_e)
    counts = jnp.zeros((tb, v_e), jnp.float32)
    for c in range(CONTEXT_LEN):                                  # static, C == 4
        counts = counts + (idx[:, c:c + 1] == iota_v).astype(jnp.float32)

    # --- Gather + context sum as one MXU matmul: (TB, V_e) @ (V_e, D_pad) ---
    lhs = jnp.dot(counts, emb_ref[...], preferred_element_type=jnp.float32)

    # --- Linear: (TB, D_pad) @ (D_pad, V_pad) + bias -------------------------
    logits = jnp.dot(lhs, w_t_ref[...],
                     preferred_element_type=jnp.float32) + b_ref[...]

    # --- LogSoftmax over the lane-dense, padded vocab axis -------------------
    # Padded lanes have bias = -1e30 -> exp() underflows to exactly 0, so they
    # never influence the max or the normalization.
    m = jnp.max(logits, axis=-1, keepdims=True)
    z = logits - m
    lse = jnp.log(jnp.sum(jnp.exp(z), axis=-1, keepdims=True))
    out_ref[...] = z - lse


def cbow_forward_batched(indices, embeddings, linear_w, linear_b,
                         *, batch_tile=None):
    """indices:    (B, CONTEXT_LEN) int context windows
       embeddings: (V, D) f32
       linear_w:   (V, D) f32  (PyTorch nn.Linear weight layout)
       linear_b:   (V,)   f32
       returns:    (B, V) f32 log-probabilities (one row per context window)
    """
    indices = jnp.asarray(indices, jnp.int32)
    bsz, ctx = indices.shape
    assert ctx == CONTEXT_LEN
    v, d = embeddings.shape

    v_pad = _round_up(v, LANE)    # output / bias / W^T lane dim
    v_emb = _round_up(v, LANE)    # one-hot contraction dim (emb sublane dim)
    d_pad = _round_up(d, LANE)    # lane-dense embedding dim

    if batch_tile is None:
        batch_tile = max(SUBLANE, min(MAX_BATCH_TILE, _round_up(bsz, SUBLANE)))
    b_pad = _round_up(bsz, batch_tile)

    # Clamp indices: VMEM refs have no runtime bounds check, so an OOB index
    # would silently read adjacent memory.  Padded batch rows reuse index 0
    # and are sliced off below.
    idx = jnp.clip(indices, 0, v - 1)
    idx_pad = jnp.zeros((b_pad, ctx), jnp.int32).at[:bsz].set(idx)

    # Lane/sublane padding (glue done in plain JAX).  Zero-padded emb rows /
    # columns and zero-padded W^T rows contribute nothing; -1e30 bias lanes
    # vanish from the softmax normalization.
    emb_pad = jnp.zeros((v_emb, d_pad), jnp.float32).at[:v, :d].set(
        embeddings.astype(jnp.float32))
    w_t_pad = jnp.zeros((d_pad, v_pad), jnp.float32).at[:d, :v].set(
        linear_w.astype(jnp.float32).T)
    bias_pad = jnp.full((1, v_pad), _NEG_BIG, jnp.float32).at[:, :v].set(
        linear_b.astype(jnp.float32))

    grid = (b_pad // batch_tile,)

    cost = pl.CostEstimate(
        flops=2 * b_pad * (v_emb * d_pad + d_pad * v_pad) + 6 * b_pad * v_pad,
        transcendentals=b_pad * v_pad + b_pad,
        bytes_accessed=4 * (v_emb * d_pad + d_pad * v_pad + v_pad
                            + b_pad * v_pad + b_pad * ctx),
    )

    out = pl.pallas_call(
        cbow_kernel,
        out_shape=jax.ShapeDtypeStruct((b_pad, v_pad), jnp.float32),
        grid_spec=pltpu.PrefetchScalarGridSpec(
            num_scalar_prefetch=0,
            grid=grid,
            in_specs=[
                pl.BlockSpec((batch_tile, ctx), lambda bt: (bt, 0)),   # indices
                pl.BlockSpec((v_emb, d_pad), lambda bt: (0, 0)),       # emb table
                pl.BlockSpec((d_pad, v_pad), lambda bt: (0, 0)),       # W^T
                pl.BlockSpec((1, v_pad), lambda bt: (0, 0)),           # bias
            ],
            out_specs=pl.BlockSpec((batch_tile, v_pad), lambda bt: (bt, 0)),
        ),
        compiler_params=pltpu.CompilerParams(
            dimension_semantics=("parallel",)),
        cost_estimate=cost,
    )(idx_pad, emb_pad, w_t_pad, bias_pad)

    return out[:bsz, :v]


def cbow_forward(indices, embeddings, linear_w, linear_b):
    """Single context window, matching the PyTorch module's forward:
       indices (CONTEXT_LEN,) -> (V,) log-probabilities."""
    out = cbow_forward_batched(indices.reshape(1, CONTEXT_LEN),
                               embeddings, linear_w, linear_b)
    return out[0]


def reference_forward(indices, embeddings, linear_w, linear_b):
    x = jnp.sum(embeddings[indices], axis=0)          # (D,)
    x = x @ linear_w.T + linear_b                      # (V,)
    return jax.nn.log_softmax(x, axis=0)               # (V,)


if __name__ == "__main__":
    key = jax.random.PRNGKey(0)
    k_emb, k_w, k_b, k_idx, k_idxb, k_idxc = jax.random.split(key, 6)

    # Deterministic synthetic parameters (shapes per the module __init__).
    embeddings = jax.random.normal(k_emb, (VOCAB_SIZE, EMBEDDING_DIM), jnp.float32)
    bound = 1.0 / (EMBEDDING_DIM ** 0.5)
    linear_w = jax.random.uniform(k_w, (VOCAB_SIZE, EMBEDDING_DIM), jnp.float32,
                                  minval=-bound, maxval=bound)
    linear_b = jax.random.uniform(k_b, (VOCAB_SIZE,), jnp.float32,
                                  minval=-bound, maxval=bound)

    ref_batched = jax.vmap(reference_forward, in_axes=(0, None, None, None))

    # --- Single context window (the module's forward signature). -----------
    indices = jax.random.randint(k_idx, (CONTEXT_LEN,), 0, VOCAB_SIZE, jnp.int32)
    out1 = cbow_forward(indices, embeddings, linear_w, linear_b)
    jax.block_until_ready(out1)
    ref1 = reference_forward(indices, embeddings, linear_w, linear_b)
    assert out1.shape == (VOCAB_SIZE,)
    assert jnp.allclose(out1, ref1, atol=1e-5, rtol=1e-5)

    # --- Small batch (single grid step). ------------------------------------
    B = 16
    indices_b = jax.random.randint(k_idxb, (B, CONTEXT_LEN), 0, VOCAB_SIZE,
                                   jnp.int32)
    out_b = cbow_forward_batched(indices_b, embeddings, linear_w, linear_b)
    jax.block_until_ready(out_b)
    ref_b = ref_batched(indices_b, embeddings, linear_w, linear_b)
    assert out_b.shape == (B, VOCAB_SIZE)
    assert jnp.allclose(out_b, ref_b, atol=1e-5, rtol=1e-5)

    # --- Larger batch: multiple grid tiles + padded tail tile. ---------------
    B2 = 300
    indices_c = jax.random.randint(k_idxc, (B2, CONTEXT_LEN), 0, VOCAB_SIZE,
                                   jnp.int32)
    out_c = cbow_forward_batched(indices_c, embeddings, linear_w, linear_b)
    jax.block_until_ready(out_c)
    ref_c = ref_batched(indices_c, embeddings, linear_w, linear_b)
    assert out_c.shape == (B2, VOCAB_SIZE)
    assert jnp.allclose(out_c, ref_c, atol=1e-5, rtol=1e-5)

    print("KERNEL_OK")
</pallas_src>

<mosaic_0001>
module attributes {stable_mosaic.version = 11 : i64} {
  func.func @cbow_kernel(%arg0: i32, %arg1: memref<8x4xi32, #tpu.memory_space<vmem>>, %arg2: memref<128x128xf32, #tpu.memory_space<vmem>>, %arg3: memref<128x128xf32, #tpu.memory_space<vmem>>, %arg4: memref<1x128xf32, #tpu.memory_space<vmem>>, %arg5: memref<8x128xf32, #tpu.memory_space<vmem>>) attributes {dimension_semantics = [#tpu.dimension_semantics<parallel>], iteration_bounds = array<i64: 1>, scalar_prefetch = 0 : i64, scratch_operands = 0 : i64, tpu.core_type = #tpu.core_type<tc>, window_params = [{transform_indices = @transform_0, window_bounds = array<i64: 8, 4>}, {pipeline_mode = #tpu.pipeline_mode<synchronous>, transform_indices = @transform_1, window_bounds = array<i64: 128, 128>}, {pipeline_mode = #tpu.pipeline_mode<synchronous>, transform_indices = @transform_2, window_bounds = array<i64: 128, 128>}, {pipeline_mode = #tpu.pipeline_mode<synchronous>, transform_indices = @transform_3, window_bounds = array<i64: 1, 128>}, {transform_indices = @transform_4, window_bounds = array<i64: 8, 128>}]} {
    %c0 = arith.constant 0 : index
    %c0_0 = arith.constant 0 : index
    %0 = vector.load %arg1[%c0, %c0_0] : memref<8x4xi32, #tpu.memory_space<vmem>>, vector<8x4xi32>
    %1 = tpu.iota {dimensions = array<i32: 1>} : vector<8x128xi32>
    %cst = arith.constant 0.000000e+00 : f32
    %2 = vector.broadcast %cst : f32 to vector<8x128xf32>
    %3 = vector.extract_strided_slice %0 {offsets = [0, 0], sizes = [8, 1], strides = [1, 1]} : vector<8x4xi32> to vector<8x1xi32>
    %4 = vector.broadcast %3 : vector<8x1xi32> to vector<8x128xi32>
    %5 = arith.cmpi eq, %4, %1 : vector<8x128xi32>
    %6 = arith.extui %5 : vector<8x128xi1> to vector<8x128xi32>
    %7 = arith.sitofp %6 : vector<8x128xi32> to vector<8x128xf32>
    %8 = arith.addf %2, %7 : vector<8x128xf32>
    %9 = vector.extract_strided_slice %0 {offsets = [0, 1], sizes = [8, 1], strides = [1, 1]} : vector<8x4xi32> to vector<8x1xi32>
    %10 = vector.broadcast %9 : vector<8x1xi32> to vector<8x128xi32>
    %11 = arith.cmpi eq, %10, %1 : vector<8x128xi32>
    %12 = arith.extui %11 : vector<8x128xi1> to vector<8x128xi32>
    %13 = arith.sitofp %12 : vector<8x128xi32> to vector<8x128xf32>
    %14 = arith.addf %8, %13 : vector<8x128xf32>
    %15 = vector.extract_strided_slice %0 {offsets = [0, 2], sizes = [8, 1], strides = [1, 1]} : vector<8x4xi32> to vector<8x1xi32>
    %16 = vector.broadcast %15 : vector<8x1xi32> to vector<8x128xi32>
    %17 = arith.cmpi eq, %16, %1 : vector<8x128xi32>
    %18 = arith.extui %17 : vector<8x128xi1> to vector<8x128xi32>
    %19 = arith.sitofp %18 : vector<8x128xi32> to vector<8x128xf32>
    %20 = arith.addf %14, %19 : vector<8x128xf32>
    %21 = vector.extract_strided_slice %0 {offsets = [0, 3], sizes = [8, 1], strides = [1, 1]} : vector<8x4xi32> to vector<8x1xi32>
    %22 = vector.broadcast %21 : vector<8x1xi32> to vector<8x128xi32>
    %23 = arith.cmpi eq, %22, %1 : vector<8x128xi32>
    %24 = arith.extui %23 : vector<8x128xi1> to vector<8x128xi32>
    %25 = arith.sitofp %24 : vector<8x128xi32> to vector<8x128xf32>
    %26 = arith.addf %20, %25 : vector<8x128xf32>
    %c0_1 = arith.constant 0 : index
    %c0_2 = arith.constant 0 : index
    %27 = vector.load %arg2[%c0_1, %c0_2] : memref<128x128xf32, #tpu.memory_space<vmem>>, vector<128x128xf32>
    %cst_3 = arith.constant dense<0.000000e+00> : vector<8x128xf32>
    %28 = tpu.matmul %26, %27, %cst_3 {dimension_numbers = #tpu.dot_dimension_numbers<[1], [0], [0], [1], [0, 0, 1, 1], [], []>} : vector<8x128xf32>, vector<128x128xf32>, vector<8x128xf32> -> vector<8x128xf32>
    %c0_4 = arith.constant 0 : index
    %c0_5 = arith.constant 0 : index
    %29 = vector.load %arg3[%c0_4, %c0_5] : memref<128x128xf32, #tpu.memory_space<vmem>>, vector<128x128xf32>
    %cst_6 = arith.constant dense<0.000000e+00> : vector<8x128xf32>
    %30 = tpu.matmul %28, %29, %cst_6 {dimension_numbers = #tpu.dot_dimension_numbers<[1], [0], [0], [1], [0, 0, 1, 1], [], []>} : vector<8x128xf32>, vector<128x128xf32>, vector<8x128xf32> -> vector<8x128xf32>
    %c0_7 = arith.constant 0 : index
    %c0_8 = arith.constant 0 : index
    %31 = vector.load %arg4[%c0_7, %c0_8] : memref<1x128xf32, #tpu.memory_space<vmem>>, vector<1x128xf32>
    %32 = vector.broadcast %31 : vector<1x128xf32> to vector<8x128xf32>
    %33 = arith.addf %30, %32 : vector<8x128xf32>
    %cst_9 = arith.constant dense<0xFF800000> : vector<8xf32>
    %34 = vector.multi_reduction <maximumf>, %33, %cst_9 [1] : vector<8x128xf32> to vector<8xf32>
    %35 = vector.shape_cast %34 : vector<8xf32> to vector<8x1xf32>
    %36 = vector.broadcast %35 : vector<8x1xf32> to vector<8x128xf32>
    %37 = arith.subf %33, %36 : vector<8x128xf32>
    %38 = math.exp %37 : vector<8x128xf32>
    %cst_10 = arith.constant dense<0.000000e+00> : vector<8xf32>
    %39 = vector.multi_reduction <add>, %38, %cst_10 [1] : vector<8x128xf32> to vector<8xf32>
    %40 = vector.shape_cast %39 : vector<8xf32> to vector<8x1xf32>
    %41 = math.log %40 : vector<8x1xf32>
    %42 = vector.broadcast %41 : vector<8x1xf32> to vector<8x128xf32>
    %43 = arith.subf %37, %42 : vector<8x128xf32>
    %c0_11 = arith.constant 0 : index
    %c0_12 = arith.constant 0 : index
    %44 = vector.load %arg5[%c0_11, %c0_12] : memref<8x128xf32, #tpu.memory_space<vmem>>, vector<8x128xf32>
    tpu.vector_store %arg5[%c0_11, %c0_12], %43 {strides = array<i32>} : memref<8x128xf32, #tpu.memory_space<vmem>>, vector<8x128xf32>,
    return
  }
  func.func @transform_0(%arg0: i32) -> (i32, i32) {
    %c0_i32 = arith.constant 0 : i32
    %c0_i32_0 = arith.constant 0 : i32
    return %arg0, %c0_i32 : i32, i32
  }
  func.func @transform_1(%arg0: i32) -> (i32, i32) {
    %c0_i32 = arith.constant 0 : i32
    %c0_i32_0 = arith.constant 0 : i32
    %c0_i32_1 = arith.constant 0 : i32
    return %c0_i32, %c0_i32_0 : i32, i32
  }
  func.func @transform_2(%arg0: i32) -> (i32, i32) {
    %c0_i32 = arith.constant 0 : i32
    %c0_i32_0 = arith.constant 0 : i32
    %c0_i32_1 = arith.constant 0 : i32
    return %c0_i32, %c0_i32_0 : i32, i32
  }
  func.func @transform_3(%arg0: i32) -> (i32, i32) {
    %c0_i32 = arith.constant 0 : i32
    %c0_i32_0 = arith.constant 0 : i32
    %c0_i32_1 = arith.constant 0 : i32
    return %c0_i32, %c0_i32_0 : i32, i32
  }
  func.func @transform_4(%arg0: i32) -> (i32, i32) {
    %c0_i32 = arith.constant 0 : i32
    %c0_i32_0 = arith.constant 0 : i32
    return %arg0, %c0_i32 : i32, i32
  }
}

</mosaic_0001>

<bundles_post_ra>
// kernel: tpu_custom_call.1
= control target key start
LH: loop header
LB: loop body
LE: loop exit
PB: predicated region body
PF: predicated region fallthrough
CT: control target
= control target key end

     0   :  { %9 = vsyncpa [#allocation3], 0  ;;  %s338_s0 = inlined_call_operand.vmem [shape: s32[8,4], index: 0, kind: input, shape index: {}]   ;;  %s339_s1 = inlined_call_operand.hbm [shape: f32[128,128], index: 1, kind: input, shape index: {}]   ;;  %s340_s2 = inlined_call_operand.hbm [shape: f32[128,128], index: 2, kind: input, shape index: {}]   ;;  %s341_s3 = inlined_call_operand.vmem [shape: f32[1,128], index: 3, kind: input, shape index: {}]   ;;  %s342_s4 = inlined_call_operand.hbm [shape: f32[8,128], index: 4, kind: output, shape index: {}]  }
   0x1   :  { %10 = vsyncpa [#allocation6], 0 }
   0x2   :  { %11 = vsyncpa [#allocation4], 0  ;;  %s18_s17 = sshll.u32 %s339_s1, 4  ;;  %s288_s18 = smov [#allocation2]   ;;  %s19_s17 = int_to_ptr.hbm [resolvable:$true] %s18_s17 }
   0x3   :  { %s20_s19 = sshll.u32 %s288_s18, 4  ;;  %s31_s22 = sshll.u32 %s340_s2, 4  ;;  %s21_s19 = int_to_ptr.vmem [resolvable:$true] %s20_s19  ;;  %s32_s22 = int_to_ptr.hbm [resolvable:$true] %s31_s22 }
   0x4   :  { %s289_s23 = smov 128   ;;  %s290_s24 = smov 8  }
   0x5   :  { %26 = dma.hbm_to_vmem [thread:$0]  %s19_s17, 2048, %s21_s19, [#allocation3], %s289_s23, %s289_s23, %s290_s24  }
   0x6   :  { %s291_s25 = smov [#allocation5]  }
   0x7   :  { %s33_s26 = sshll.u32 %s291_s25, 4  ;;  %s34_s26 = int_to_ptr.vmem [resolvable:$true] %s33_s26 }
   0x8   :  { %39 = dma.hbm_to_vmem [thread:$0]  %s32_s22, 2048, %s34_s26, [#allocation6], %s289_s23, %s289_s23, %s290_s24  }
   0x9   :  { %282 = dma.done.wait [#allocation3], 2048  }
   0xa   :  { %283 = vsyncadd [#allocation3], 4294965248 }
   0xb   :  { %284 = dma.done.wait [#allocation6], 2048  }
   0xc   :  { %285 = vsyncadd [#allocation6], 4294965248  ;;  %v292_v0 = vmov 0   ;;  %v293_v1 = vmov 2   ;;  %v50_v2 = vld [vmem:[%s338_s0] sm:$0xff]  ;;  %v96_v3 = vld [vmem:[#allocation2 + $0x78] sm:$0xff]  ;;  %v51_v29 = vlaneseq }
   0xd   :  { %200 = vset.pattern.permute.xlu0 %v292_v0  ;;  %202 = vset.pattern.permute.xlu1 %v293_v1  ;;  %v95_v4 = vld [vmem:[#allocation2 + $0x70] sm:$0xff]  ;;  %v94_v5 = vld [vmem:[#allocation2 + $0x68] sm:$0xff]  ;;  %v93_v6 = vld [vmem:[#allocation2 + $0x60] sm:$0xff]  ;;  %v294_v8 = vmov 1   ;;  %v295_v9 = vmov 3   ;;  %v296_v41 = vmov 0.0  }
   0xe   :  { %54 = vperm.xlu0 %200, %v50_v2   ;;  %68 = vperm.xlu1 %202, %v50_v2   ;;  %v92_v7 = vld [vmem:[#allocation2 + $0x58] sm:$0xff]  ;;  %v91_v10 = vld [vmem:[#allocation2 + $0x50] sm:$0xff]  ;;  %v90_v11 = vld [vmem:[#allocation2 + $0x48] sm:$0xff]  ;;  %v52_v34 = vand.u32 127, %v51_v29  ;;  %s297_s28 = smov [#allocation7]   ;;  %s175_s6 = sshll.u32 %s342_s4, 4  ;;  %s176_s6 = int_to_ptr.hbm [resolvable:$true] %s175_s6 }
   0xf   :  { %97 = vmatpush.msra.mxu0 %v96_v3  ;;  %v89_v12 = vld [vmem:[#allocation2 + $0x40] sm:$0xff]  ;;  %v88_v13 = vld [vmem:[#allocation2 + $0x38] sm:$0xff]  ;;  %v87_v14 = vld [vmem:[#allocation2 + $0x30] sm:$0xff]  ;;  %s173_s29 = sshll.u32 %s297_s28, 4  ;;  %s174_s29 = int_to_ptr.vmem [resolvable:$true] %s173_s29 }
  0x10   :  { %v86_v15 = vld [vmem:[#allocation2 + $0x28] sm:$0xff]  ;;  %v85_v16 = vld [vmem:[#allocation2 + $0x20] sm:$0xff]  ;;  %v84_v17 = vld [vmem:[#allocation2 + $0x18] sm:$0xff] }
  0x11   :  { %98 = vmatpush.msra.mxu0 %v95_v4  ;;  %v83_v18 = vld [vmem:[#allocation2 + $0x10] sm:$0xff]  ;;  %v82_v19 = vld [vmem:[#allocation2 + $0x8] sm:$0xff]  ;;  %v81_v20 = vld [vmem:[#allocation2] sm:$0xff] }
  0x12   :  { %v132_v21 = vld [vmem:[#allocation5 + $0x78] sm:$0xff]  ;;  %v131_v22 = vld [vmem:[#allocation5 + $0x70] sm:$0xff]  ;;  %v130_v23 = vld [vmem:[#allocation5 + $0x68] sm:$0xff] }
  0x13   :  { %99 = vmatpush.msra.mxu0 %v94_v5  ;;  %137 = vmatpush.msra.mxu1 %v132_v21  ;;  %v129_v24 = vld [vmem:[#allocation5 + $0x60] sm:$0xff]  ;;  %v128_v25 = vld [vmem:[#allocation5 + $0x58] sm:$0xff]  ;;  %v127_v26 = vld [vmem:[#allocation5 + $0x50] sm:$0xff] }
  0x14   :  { %v126_v27 = vld [vmem:[#allocation5 + $0x48] sm:$0xff]  ;;  %v125_v28 = vld [vmem:[#allocation5 + $0x40] sm:$0xff]  ;;  %v124_v32 = vld [vmem:[#allocation5 + $0x38] sm:$0xff] }
  0x15   :  { %100 = vmatpush.msra.mxu0 %v93_v6  ;;  %138 = vmatpush.msra.mxu1 %v131_v22  ;;  %v123_v33 = vld [vmem:[#allocation5 + $0x30] sm:$0xff]  ;;  %v122_v35 = vld [vmem:[#allocation5 + $0x28] sm:$0xff]  ;;  %v121_v36 = vld [vmem:[#allocation5 + $0x20] sm:$0xff] }
  0x16   :  { %201 = vset.pattern.permute.xlu0 %v294_v8  ;;  %203 = vset.pattern.permute.xlu1 %v295_v9  ;;  %v120_v37 = vld [vmem:[#allocation5 + $0x18] sm:$0xff]  ;;  %v119_v40 = vld [vmem:[#allocation5 + $0x10] sm:$0xff]  ;;  %v118_v45 = vld [vmem:[#allocation5 + $0x8] sm:$0xff] }
  0x17   :  { %61 = vperm.xlu0 %201, %v50_v2   ;;  %75 = vperm.xlu1 %203, %v50_v2   ;;  %v117_v50 = vld [vmem:[#allocation5] sm:$0xff] }
  0x18   :  { %101 = vmatpush.msra.mxu0 %v92_v7  ;;  %139 = vmatpush.msra.mxu1 %v130_v23  ;;  %v205_v52 = vld [vmem:[%s341_s3] ss:$0 sm:$0xff] }
  0x1a   :  { %102 = vmatpush.msra.mxu0 %v91_v10  ;;  %140 = vmatpush.msra.mxu1 %v129_v24 }
  0x1c   :  { %103 = vmatpush.msra.mxu0 %v90_v11  ;;  %141 = vmatpush.msra.mxu1 %v128_v25 }
  0x1e   :  { %104 = vmatpush.msra.mxu0 %v89_v12  ;;  %142 = vmatpush.msra.mxu1 %v127_v26 }
  0x1f   :  { %204 = vset.pattern.permute.xlu0 %v295_v9 }
  0x20   :  { %105 = vmatpush.msra.mxu0 %v88_v13  ;;  %143 = vmatpush.msra.mxu1 %v126_v27 }
  0x22   :  { %106 = vmatpush.msra.mxu0 %v87_v14  ;;  %144 = vmatpush.msra.mxu1 %v125_v28 }
  0x24   :  { %107 = vmatpush.msra.mxu0 %v86_v15  ;;  %145 = vmatpush.msra.mxu1 %v124_v32 }
  0x26   :  { %108 = vmatpush.msra.mxu0 %v85_v16  ;;  %146 = vmatpush.msra.mxu1 %v123_v33 }
  0x28   :  { %109 = vmatpush.msra.mxu0 %v84_v17  ;;  %147 = vmatpush.msra.mxu1 %v122_v35 }
  0x2a   :  { %110 = vmatpush.msra.mxu0 %v83_v18  ;;  %148 = vmatpush.msra.mxu1 %v121_v36 }
  0x2c   :  { %111 = vmatpush.msra.mxu0 %v82_v19  ;;  %149 = vmatpush.msra.mxu1 %v120_v37 }
  0x2e   :  { %112 = vmatpush.msra.mxu0 %v81_v20  ;;  %150 = vmatpush.msra.mxu1 %v119_v40 }
  0x30   :  { %151 = vmatpush.msra.mxu1 %v118_v45 }
  0x32   :  { %152 = vmatpush.msra.mxu1 %v117_v50 }
  0x80   :  { %v55_v30 = vpop.permute.xlu0 %54  ;;  %v69_v31 = vpop.permute.xlu1 %68 }
  0x81   :  { %vm56_vm0 = vcmp.eq.s32.totalorder %v55_v30, %v52_v34  ;;  %vm70_vm1 = vcmp.eq.s32.totalorder %v69_v31, %v52_v34 }
  0x82   :  { %v186_v42 = vsel %vm56_vm0, 1.0, %v296_v41  ;;  %v188_v46 = vsel %vm70_vm1, 1.0, %v296_v41 }
  0x89   :  { %v62_v38 = vpop.permute.xlu0 %61  ;;  %v76_v39 = vpop.permute.xlu1 %75 }
  0x8a   :  { %vm63_vm2 = vcmp.eq.s32.totalorder %v62_v38, %v52_v34  ;;  %vm77_vm3 = vcmp.eq.s32.totalorder %v76_v39, %v52_v34 }
  0x8b   :  { %v187_v43 = vsel %vm63_vm2, 1.0, %v296_v41  ;;  %v189_v47 = vsel %vm77_vm3, 1.0, %v296_v41 }
  0x8c   :  { %v66_v44 = vadd.f32 %v187_v43, %v186_v42 }
  0x8e   :  { %v73_v48 = vadd.f32 %v188_v46, %v66_v44 }
  0x90   :  { %v80_v49 = vadd.f32 %v189_v47, %v73_v48 }
  0x92   :  { %113 = vmatmul.f32.vlgmr.msra.gmra.mxu0 %v80_v49 }
 0x10f   :  { %v114_v51 = vpop.f32.mrf.mxu0 }
 0x110   :  { %153 = vmatmul.f32.vlgmr.msra.gmra.mxu1 %v114_v51 }
 0x18d   :  { %v154_v53 = vpop.f32.mrf.mxu1 }
 0x18e   :  { %v155_v54 = vadd.f32 %v205_v52, %v154_v53 }
 0x190   :  { %157 = vmax.xlane.f32.xlu2 %v155_v54 }
 0x203   :  { %v158_v55 = vpop.xlane.xlu2 %157 }
 0x204   :  { %v159_v56 = vsub.f32 %v155_v54, %v158_v55 }
 0x206   :  { %v160_v57 = vmul.f32 1.442695, %v159_v56 }
 0x208   :  { %206 = vpow2.f32 %v160_v57 }
 0x20e   :  { %v207_v58 = vpop.eup %206 }
 0x20f   :  { %162 = vadd.xlane.f32.xlu2 %v207_v58 }
 0x282   :  { %v163_v59 = vpop.xlane.xlu2 %162 }
 0x283   :  { %208 = vlog2.f32 %v163_v59 }
 0x289   :  { %v209_v60 = vpop.eup %208 }
 0x28a   :  { %v165_v61 = vmul.f32 0.6931472, %v209_v60 }
 0x28c   :  { %v166_v62 = vsub.f32 %v159_v56, %v165_v61 }
 0x28e   :  { %167 = vst [vmem:[#allocation7] sm:$0xff] %v166_v62 }
 0x28f   :  { %178 = dma.vmem_to_hbm [thread:$0]  %s174_s29, 128, %s176_s6, [#allocation4]  }
 0x290   :  { %286 = dma.done.wait [#allocation4], 128  }
 0x291   :  { %287 = vsyncadd [#allocation4], 4294967168 }
 0x292   :  { %183 = vsyncpa [#allocation3], 1 }
 0x293   :  { %184 = vsyncpa [#allocation6], 1 }
 0x294   :  { %185 = vsyncpa [#allocation4], 1 }

</bundles_post_ra>
